<compile_context>
chip_gen: v7x
topology: tpu7x:2x2x1
jax: 0.10.0
libtpu: 0.0.40
codegen_flags: <defaults>
</compile_context>

<pallas_src>
import numpy as np
import jax
import jax.numpy as jnp
from jax.experimental import pallas as pl
from jax.experimental.pallas import tpu as pltpu


def _selection_kernel(xcol_ref, w1_ref, b1_ref, w2_ref, b2_ref, o_ref):
    # xcol_ref: (9*C, T)   im2col'd input chunk, spatial on the lane axis
    # w1_ref  : (HC, 9*C)  fused conv1 weights (single K = 9*C matmul)
    # b1_ref  : (HC, 1)    conv1 bias, broadcast along lanes
    # w2_ref  : (1, HC)    conv2 (1x1) weights as a row vector
    # b2_ref  : (1,) SMEM  conv2 bias (scalar)
    # o_ref   : (1, T)     sigmoid output chunk (lane-dense)
    h = jnp.dot(w1_ref[...], xcol_ref[...],
                preferred_element_type=jnp.float32)          # (HC, T) on MXU
    h = jnp.maximum(h + b1_ref[...], 0.0)                    # bias + ReLU (full-width VPU)
    z = jnp.dot(w2_ref[...], h,
                preferred_element_type=jnp.float32) + b2_ref[0]   # (1, T) on MXU
    # sigmoid(z) = 0.5*(tanh(z/2)+1): one EUP transcendental, no VPU divide,
    # full f32 accuracy (addresses the "use the EUP slot" feedback).
    o_ref[...] = 0.5 * (jnp.tanh(0.5 * z) + 1.0)


def selection_by_cnn_1_forward(x_nchw, w1, b1, w2, b2):
    """x_nchw: (N, C, H, W) f32; weights in PyTorch layout:
       w1: (HC, C, 3, 3), b1: (HC,), w2: (1, HC, 1, 1), b2: (1,)."""
    N, C, H, W = x_nchw.shape
    HC = w1.shape[0]
    total = N * H * W

    # ---- glue (plain JAX/XLA): im2col + weight repacking, lane-dense ----
    x = x_nchw.astype(jnp.float32)
    x_pad = jnp.pad(x, ((0, 0), (0, 0), (1, 1), (1, 1)))         # zero pad spatial
    taps = [x_pad[:, :, dy:dy + H, dx:dx + W]                    # (N, C, H, W) per tap
            for dy in range(3) for dx in range(3)]
    # (9, N, C, H, W) -> (9, C, N, H, W) -> (9*C, N*H*W): tap-major, channel-minor.
    xcol = jnp.stack(taps, 0).transpose(0, 2, 1, 3, 4).reshape(9 * C, total)

    # Pad lane axis to a multiple of 128; split into two parallel chunks when
    # possible so v7x's two TensorCores both get work (neutral on v5e/v6e).
    total_pad = ((total + 127) // 128) * 128
    if total_pad != total:
        xcol = jnp.pad(xcol, ((0, 0), (0, total_pad - total)))
    if total_pad % 256 == 0:
        num_chunks, chunk = 2, total_pad // 2
    else:
        num_chunks, chunk = 1, total_pad

    # conv1 weights (HC, C, 3, 3) -> (HC, 3, 3, C) -> (HC, 9*C), matching xcol order.
    w1m = jnp.transpose(w1, (0, 2, 3, 1)).reshape(HC, 9 * C).astype(jnp.float32)
    b1c = b1.reshape(HC, 1).astype(jnp.float32)
    w2r = w2.reshape(1, HC).astype(jnp.float32)
    b2s = b2.reshape(1).astype(jnp.float32)

    out = pl.pallas_call(
        _selection_kernel,
        out_shape=jax.ShapeDtypeStruct((1, total_pad), jnp.float32),
        grid_spec=pltpu.PrefetchScalarGridSpec(
            num_scalar_prefetch=0,
            grid=(num_chunks,),
            in_specs=[
                pl.BlockSpec((9 * C, chunk), lambda j: (0, j)),
                pl.BlockSpec((HC, 9 * C), lambda j: (0, 0)),
                pl.BlockSpec((HC, 1), lambda j: (0, 0)),
                pl.BlockSpec((1, HC), lambda j: (0, 0)),
                pl.BlockSpec(memory_space=pltpu.MemorySpace.SMEM),
            ],
            out_specs=pl.BlockSpec((1, chunk), lambda j: (0, j)),
        ),
        compiler_params=pltpu.CompilerParams(
            dimension_semantics=("parallel",)),
    )(xcol, w1m, b1c, w2r, b2s)

    # torch's .squeeze(): (N, 1, H, W) -> drop all size-1 dims.
    return jnp.squeeze(out[0, :total].reshape(N, H, W))


def _reference(x_nchw, w1, b1, w2, b2):
    y = jax.lax.conv_general_dilated(
        x_nchw, w1, window_strides=(1, 1), padding=((1, 1), (1, 1)),
        dimension_numbers=("NCHW", "OIHW", "NCHW"))
    y = jax.nn.relu(y + b1[None, :, None, None])
    z = jax.lax.conv_general_dilated(
        y, w2, window_strides=(1, 1), padding=((0, 0), (0, 0)),
        dimension_numbers=("NCHW", "OIHW", "NCHW"))
    z = jax.nn.sigmoid(z + b2[None, :, None, None])
    return jnp.squeeze(z)


if __name__ == "__main__":
    # Small shapes consistent with the module: batch=2, channels=4, 16x16
    # spatial, hidden conv channels = 32.
    N, C, H, W, HC = 2, 4, 16, 16, 32

    key = jax.random.PRNGKey(0)
    kx, k1, k2, k3, k4 = jax.random.split(key, 5)

    x = jax.random.normal(kx, (N, C, H, W), dtype=jnp.float32)

    # Deterministic parameter init (uniform in +-1/sqrt(fan_in), a la PyTorch).
    bound1 = 1.0 / np.sqrt(C * 3 * 3)
    w1 = jax.random.uniform(k1, (HC, C, 3, 3), jnp.float32, -bound1, bound1)
    b1 = jax.random.uniform(k2, (HC,), jnp.float32, -bound1, bound1)
    bound2 = 1.0 / np.sqrt(HC * 1 * 1)
    w2 = jax.random.uniform(k3, (1, HC, 1, 1), jnp.float32, -bound2, bound2)
    b2 = jax.random.uniform(k4, (1,), jnp.float32, -bound2, bound2)

    out = selection_by_cnn_1_forward(x, w1, b1, w2, b2)
    out = jax.block_until_ready(out)

    ref = jax.block_until_ready(_reference(x, w1, b1, w2, b2))
    np.testing.assert_allclose(np.asarray(out), np.asarray(ref),
                               rtol=1e-5, atol=1e-5)
    print("KERNEL_OK")
</pallas_src>

<mosaic_0001>
module attributes {stable_mosaic.version = 11 : i64} {
  func.func @_selection_kernel(%arg0: i32, %arg1: memref<36x256xf32, #tpu.memory_space<vmem>>, %arg2: memref<32x36xf32, #tpu.memory_space<vmem>>, %arg3: memref<32x1xf32, #tpu.memory_space<vmem>>, %arg4: memref<1x32xf32, #tpu.memory_space<vmem>>, %arg5: memref<1xf32, #tpu.memory_space<smem>>, %arg6: memref<1x256xf32, #tpu.memory_space<vmem>>) attributes {dimension_semantics = [#tpu.dimension_semantics<parallel>], iteration_bounds = array<i64: 2>, scalar_prefetch = 0 : i64, scratch_operands = 0 : i64, tpu.core_type = #tpu.core_type<tc>, window_params = [{transform_indices = @transform_0, window_bounds = array<i64: 36, 256>}, {pipeline_mode = #tpu.pipeline_mode<synchronous>, transform_indices = @transform_1, window_bounds = array<i64: 32, 36>}, {pipeline_mode = #tpu.pipeline_mode<synchronous>, transform_indices = @transform_2, window_bounds = array<i64: 32, 1>}, {pipeline_mode = #tpu.pipeline_mode<synchronous>, transform_indices = @transform_3, window_bounds = array<i64: 1, 32>}, {transform_indices = @transform_4, window_bounds = array<i64: 1>}, {transform_indices = @transform_5, window_bounds = array<i64: 1, 256>}]} {
    %c0 = arith.constant 0 : index
    %c0_0 = arith.constant 0 : index
    %0 = vector.load %arg2[%c0, %c0_0] : memref<32x36xf32, #tpu.memory_space<vmem>>, vector<32x36xf32>
    %c0_1 = arith.constant 0 : index
    %c0_2 = arith.constant 0 : index
    %1 = vector.load %arg1[%c0_1, %c0_2] : memref<36x256xf32, #tpu.memory_space<vmem>>, vector<36x256xf32>
    %cst = arith.constant dense<0.000000e+00> : vector<32x256xf32>
    %2 = tpu.matmul %0, %1, %cst {dimension_numbers = #tpu.dot_dimension_numbers<[1], [0], [0], [1], [0, 0, 1, 1], [], []>} : vector<32x36xf32>, vector<36x256xf32>, vector<32x256xf32> -> vector<32x256xf32>
    %c0_3 = arith.constant 0 : index
    %c0_4 = arith.constant 0 : index
    %3 = vector.load %arg3[%c0_3, %c0_4] : memref<32x1xf32, #tpu.memory_space<vmem>>, vector<32x1xf32>
    %4 = vector.broadcast %3 : vector<32x1xf32> to vector<32x256xf32>
    %5 = arith.addf %2, %4 : vector<32x256xf32>
    %cst_5 = arith.constant 0.000000e+00 : f32
    %6 = vector.broadcast %cst_5 : f32 to vector<32x256xf32>
    %7 = arith.maximumf %5, %6 : vector<32x256xf32>
    %c0_6 = arith.constant 0 : index
    %c0_7 = arith.constant 0 : index
    %8 = vector.load %arg4[%c0_6, %c0_7] : memref<1x32xf32, #tpu.memory_space<vmem>>, vector<1x32xf32>
    %cst_8 = arith.constant dense<0.000000e+00> : vector<1x256xf32>
    %9 = tpu.matmul %8, %7, %cst_8 {dimension_numbers = #tpu.dot_dimension_numbers<[1], [0], [0], [1], [0, 0, 1, 1], [], []>} : vector<1x32xf32>, vector<32x256xf32>, vector<1x256xf32> -> vector<1x256xf32>
    %c0_9 = arith.constant 0 : index
    %10 = memref.load %arg5[%c0_9] : memref<1xf32, #tpu.memory_space<smem>>
    %11 = vector.broadcast %10 : f32 to vector<1x256xf32>
    %12 = arith.addf %9, %11 : vector<1x256xf32>
    %cst_10 = arith.constant 5.000000e-01 : f32
    %13 = vector.broadcast %cst_10 : f32 to vector<1x256xf32>
    %14 = arith.mulf %13, %12 : vector<1x256xf32>
    %15 = math.tanh %14 : vector<1x256xf32>
    %cst_11 = arith.constant 1.000000e+00 : f32
    %16 = vector.broadcast %cst_11 : f32 to vector<1x256xf32>
    %17 = arith.addf %15, %16 : vector<1x256xf32>
    %cst_12 = arith.constant 5.000000e-01 : f32
    %18 = vector.broadcast %cst_12 : f32 to vector<1x256xf32>
    %19 = arith.mulf %18, %17 : vector<1x256xf32>
    %c0_13 = arith.constant 0 : index
    %c0_14 = arith.constant 0 : index
    %20 = vector.load %arg6[%c0_13, %c0_14] : memref<1x256xf32, #tpu.memory_space<vmem>>, vector<1x256xf32>
    tpu.vector_store %arg6[%c0_13, %c0_14], %19 {strides = array<i32>} : memref<1x256xf32, #tpu.memory_space<vmem>>, vector<1x256xf32>,
    return
  }
  func.func @transform_0(%arg0: i32) -> (i32, i32) {
    %c0_i32 = arith.constant 0 : i32
    %c0_i32_0 = arith.constant 0 : i32
    return %c0_i32, %arg0 : i32, i32
  }
  func.func @transform_1(%arg0: i32) -> (i32, i32) {
    %c0_i32 = arith.constant 0 : i32
    %c0_i32_0 = arith.constant 0 : i32
    %c0_i32_1 = arith.constant 0 : i32
    return %c0_i32, %c0_i32_0 : i32, i32
  }
  func.func @transform_2(%arg0: i32) -> (i32, i32) {
    %c0_i32 = arith.constant 0 : i32
    %c0_i32_0 = arith.constant 0 : i32
    %c0_i32_1 = arith.constant 0 : i32
    return %c0_i32, %c0_i32_0 : i32, i32
  }
  func.func @transform_3(%arg0: i32) -> (i32, i32) {
    %c0_i32 = arith.constant 0 : i32
    %c0_i32_0 = arith.constant 0 : i32
    %c0_i32_1 = arith.constant 0 : i32
    return %c0_i32, %c0_i32_0 : i32, i32
  }
  func.func @transform_4(%arg0: i32) -> i32 {
    %c0_i32 = arith.constant 0 : i32
    %c0_i32_0 = arith.constant 0 : i32
    return %c0_i32 : i32
  }
  func.func @transform_5(%arg0: i32) -> (i32, i32) {
    %c0_i32 = arith.constant 0 : i32
    %c0_i32_0 = arith.constant 0 : i32
    return %c0_i32, %arg0 : i32, i32
  }
}

</mosaic_0001>

<bundles_post_ra>
// kernel: tpu_custom_call.1
= control target key start
LH: loop header
LB: loop body
LE: loop exit
PB: predicated region body
PF: predicated region fallthrough
CT: control target
= control target key end

     0   :  { %s1027_s0 = inlined_call_operand.hbm [shape: f32[36,512], index: 0, kind: input, shape index: {}]   ;;  %s1028_s1 = inlined_call_operand.vmem [shape: f32[32,36], index: 1, kind: input, shape index: {}]   ;;  %s1029_s2 = inlined_call_operand.vmem [shape: f32[32,1], index: 2, kind: input, shape index: {}]   ;;  %s1030_s3 = inlined_call_operand.vmem [shape: f32[1,32], index: 3, kind: input, shape index: {}]   ;;  %s1031_s4 = inlined_call_operand.<no memory space> [shape: f32[1], index: 4, kind: input, shape index: {}]   ;;  %s1032_s5 = inlined_call_operand.hbm [shape: f32[1,512], index: 5, kind: output, shape index: {}]  }
   0x1   :  { %10 = sst [smem:[#allocation2]] %s1031_s4 }
   0x2   :  { %11 = vsyncpa [#allocation4], 0 }
   0x3   :  { %13 = vsyncpa [#allocation4 + $0x1], 0 }
   0x4   :  { %14 = vsyncpa [#allocation5], 0 }
   0x5   :  { %16 = vsyncpa [#allocation5 + $0x1], 0  ;;  %s831_s20 = smov 0   ;;  %s833_s21 = smov 0  }
   0x6   :  { %s835_s22 = smov 0   ;;  %s837_s23 = smov 0  }
   0x7 LB: > { %s852_s4 = sadd.s32 4294967295, %s788_s23   ;;  %s595_s24 = sadd.s32 4294967294, %s788_s23   ;;  %s788_s23 = sphi %s837_s23, %s1045_s23   ;;  %s784_s22 = sphi %s835_s22, %s1044_s22   ;;  %s780_s21 = sphi %s833_s21, %s1043_s21   ;;  %s776_s20 = sphi %s831_s20, %s1042_s20  }
   0x8   : > { %s856_s25 = sadd.s32 1, %s788_s23   ;;  %s29_s26 = sadd.s32 1, %s784_s22 }
   0x9   : > { %s26_s27 = ssub.s32 %s788_s23, %s856_s25  ;;  %p36_p0 = scmp.ne.s32.totalorder %s784_s22, %s780_s21 }
   0xa   : > { %p27_p1 = scmp.eq.s32.totalorder %s26_s27, 0  ;;  %p37_p2 = scmp.eq.s32.totalorder %s788_s23, 0 }
   0xb   : > { %p42_p3 = scmp.ne.s32.totalorder %s780_s21, %s776_s20  ;;  %p43_p4 = scmp.eq.s32.totalorder %s852_s4, 0 }
   0xc   : > { %s868_s28 = scalar_select %p27_p1, %s784_s22, %s29_s26  }
   0xd   : > { %p38_p5 = por %p37_p2, %p36_p0  ;;  %p870_p6 = por %p43_p4, %p42_p3 }
   0xe   : > { %p150_p7 = scmp.eq.s32.totalorder %s852_s4, 1  ;;  %p156_p8 = scmp.eq.s32.totalorder %s595_s24, 1 }
   0xf   : > { %p646_p10 = scmp.lt.s32.totalorder %s788_s23, 2  ;;  %s188_s7 = sand.u32 1, %s784_s22  }
  0x10   : > { %p877_p11 = por %p150_p7, %p36_p0  ;;  %p881_p12 = por %p156_p8, %p42_p3 }
  0x11   : > { %s614_s8 = sshll.u32 %s788_s23, 8  ;;  %s632_s9 = smul.u32 80, %s188_s7 }
  0x12   : > { %s1035_s30 = scalar_select %p877_p11, 1, 0 }
  0x13   : > { %s1036_s6 = scalar_select %p881_p12, 1, 0 }
  0x14   : > { %s890_s12 = scalar_lea.hbm %s1027_s0, %s614_s8  ;;  %p892_p13 = pnand %p646_p10, %p38_p5 }
  0x15   : > { %s192_s14 = scalar_lea.vmem [#allocation3], %s632_s9  ;;  %s899_s16 = scalar_lea.sflag [#allocation4], %s188_s7 }
  0x16   : > { %s199_s15 = sshll.u32 %s192_s14, 4  ;;  %s692_s17 = scalar_lea.hbm %s890_s12, 1280  ;;  %s896_s15 = int_to_ptr.vmem [resolvable:$true] %s199_s15 }
  0x17   : > { %p693_p1 = scmp.ne.s32.totalorder %s890_s12, %s692_s17  ;;  %p694_p2 = pneg %p892_p13 }
  0x18   : > { %s697_s24 = scalar_lea.hbm %s1027_s0, 2560  ;;  %p698_p5 = scmp.lt.u32.totalorder %s890_s12, %s1027_s0 }
  0x19   : > { %p695_p3 = pnand %p694_p2, %p693_p1  ;;  %p699_p7 = scmp.lt.u32.totalorder %s697_s24, %s692_s17 }
  0x1a   : > { %p701_p10 = scmp.lt.u32.totalorder %s692_s17, %s890_s12 }
  0x1b   : > { %p696_p4 = pneg %p695_p3  ;;  %p700_p8 = por %p699_p7, %p698_p5 }
  0x1d   : > { %p702_p9 = por %p701_p10, %p700_p8 }
  0x1f   : > { %p703_p0 = pnand %p702_p9, %p696_p4 }
  0x21   : > { %706 = shalt.err (!%p703_p0)
}
  0x22   : > { %s707_s7 = scalar_lea.vmem %s896_s15, 1280  ;;  %s790_s8 = smov [#allocation3]  }
  0x23   : > { %p708_p1 = scmp.ne.s32.totalorder %s896_s15, %s707_s7  ;;  %s712_s9 = sshll.u32 %s790_s8, 4  ;;  %s713_s9 = int_to_ptr.vmem [resolvable:$false] %s712_s9 }
  0x24   : > { %s714_s10 = scalar_lea.vmem %s713_s9, 2560  ;;  %p715_p11 = scmp.lt.s32.totalorder %s896_s15, %s713_s9 }
  0x25   : > { %p710_p3 = pnand %p708_p1, %p694_p2  ;;  %p716_p5 = scmp.lt.s32.totalorder %s714_s10, %s707_s7 }
  0x27   : > { %p711_p12 = pneg %p710_p3  ;;  %p717_p7 = por %p716_p5, %p715_p11 }
  0x29   : > { %p718_p8 = pnand %p717_p7, %p711_p12 }
  0x2b   : > { %721 = shalt.err (!%p718_p8)
}
  0x2c   : > { %s791_s11 = smov 512   ;;  %s792_s14 = smov 256  }
  0x2d   : > { %s793_s17 = smov 16   ;;  %p207_p9 = scmp.lt.s32.totalorder %s788_s23, 3 }
  0x2e   : > { %641 = dma.hbm_to_vmem [thread:$0]  (!%p892_p13), %s890_s12, 1280, %s896_s15, %s899_s16, %s791_s11, %s792_s14, %s793_s17  }
  0x2f   : > { %p1038_p0 = scmp.ge.s32.totalorder %s788_s23, 1 }
  0x31   : > { %p208_p2 = pnand %p1038_p0, %p207_p9 }
  0x32   : > { %s931_s18 = sand.u32 (!%p208_p2), 1, %s780_s21  }
  0x33   : > { %211 = sbr.rel (%p208_p2) target bundleno = 559 (0x22f), region = 40  ;;  %s214_s24 = scalar_lea.sflag (!%p208_p2), [#allocation4], %s931_s18 }
  0x34   : > { %s633_s19 = smul.u32 (!%p208_p2), 80, %s931_s18 }
  0x36   : > { %s935_s26 = scalar_lea.vmem (!%p208_p2), [#allocation3], %s633_s19 }
  0x3a   : > { %767 = dma.done.wait (%p870_p6), %s214_s24, 1280  }
  0x3b   : > { %769 = vsyncadd (%p870_p6), %s214_s24, 4294966016  ;;  %v794_v0 = vmov 0.0   ;;  %v795_v1 = vmov 0   ;;  %v251_v2 = vld [vmem:[%s935_s26 + $0x8] sm:$0xff]  ;;  %v253_v3 = vld [vmem:[%s935_s26 + $0x18] sm:$0xff]  ;;  %vm297_vm0 = vcmask 1043456  }
  0x3c   : > { %368 = vmatprep.mubr.f32.mxu0 %v794_v0  ;;  %686 = vset.pattern.permute.xlu0 %v795_v1  ;;  %v250_v4 = vld [vmem:[%s935_s26] sm:$0xff]  ;;  %v616_v5 = vpack.c.bf16 %v253_v3, %v251_v2  ;;  %v252_v6 = vld [vmem:[%s935_s26 + $0x10] sm:$0xff]  ;;  %v255_v7 = vld [vmem:[%s935_s26 + $0x28] sm:$0xff]  ;;  %vm284_vm1 = vcmask 293888   ;;  %vm404_vm2 = vcmask 261120   ;;  %s402_s13 = sld [smem:[#allocation2]]  ;;  %v493_v2 = vlaneseq }
  0x3d   : > { %687 = vset.pattern.permute.xlu1 %v795_v1  ;;  %472 = vmatprep.mubr.f32.mxu1 %v794_v0  ;;  %v257_v8 = vld [vmem:[%s935_s26 + $0x38] sm:$0xff]  ;;  %v618_v9 = vpack.c.bf16 %v252_v6, %v250_v4  ;;  %v254_v11 = vld [vmem:[%s935_s26 + $0x20] sm:$0xff]  ;;  %v256_v12 = vld [vmem:[%s935_s26 + $0x30] sm:$0xff]  ;;  %s601_s15 = sshll.u32 %s931_s18, 1  ;;  %s615_s16 = sshll.u32 %s852_s4, 5 }
  0x3e   : > { %v620_v10 = vpack.c.bf16 %v257_v8, %v255_v7  ;;  %617 = vmatprep.subr.bf16.mxu0 %v616_v5  ;;  %v622_v13 = vpack.c.bf16 %v256_v12, %v254_v11  ;;  %v260_v14 = vld [vmem:[%s1029_s2] sm:$0xff]  ;;  %v262_v15 = vld [vmem:[%s1029_s2 + $0x10] sm:$0xff]  ;;  %v259_v16 = vld [vmem:[%s935_s26 + $0x48] sm:$0xf]  ;;  %v494_v5 = vshrl.u32 %v493_v2, 7  ;;  %s243_s27 = scalar_lea.vmem [#allocation6], %s601_s15  ;;  %s983_s10 = scalar_lea.hbm %s1032_s5, %s615_s16 }
  0x3f   : > { %619 = vmatpush1.bf16.msra.mxu0 %v618_v9  ;;  %266 = vperm.xlu0 %686, %v260_v14   ;;  %v261_v17 = vld [vmem:[%s1029_s2 + $0x8] sm:$0xff]  ;;  %v263_v18 = vld [vmem:[%s1029_s2 + $0x18] sm:$0xff]  ;;  %v258_v19 = vld [vmem:[%s935_s26 + $0x40] sm:$0xf]  ;;  %s525_s7 = sshll.u32 %s243_s27, 4  ;;  %vm507_vm3 = vcmp.lt.s32.totalorder %v493_v2, 256  ;;  %s985_s7 = int_to_ptr.vmem [resolvable:$true] %s525_s7 }
  0x40   : > { %621 = vmatprep.subr.bf16.mxu0 %v620_v10  ;;  %276 = vperm.xlu1 %687, %v262_v15   ;;  %v246_v20 = vld [vmem:[%s1028_s1] sm:$0xff]  ;;  %v247_v21 = vld [vmem:[%s1028_s1 + $0x8] sm:$0xff]  ;;  %v248_v22 = vld [vmem:[%s1028_s1 + $0x10] sm:$0xff]  ;;  %s511_s11 = scalar_lea.sflag [#allocation5], %s931_s18  ;;  %s722_s14 = scalar_lea.vmem %s985_s7, 32 }
  0x41   : > { %v249_v23 = vld [vmem:[%s1028_s1 + $0x18] sm:$0xff]  ;;  %v401_v56 = vld [vmem:[%s1030_s3] sm:$0x1]  ;;  %p723_p6 = scmp.ne.s32.totalorder %s985_s7, %s722_s14  ;;  %p1039_p11 = scmp.ne.s32.totalorder %s1035_s30, 0 }
  0x42   : > { %v403_v57 = vstv %s402_s13  ;;  %s797_s4 = smov [#allocation6]  }
  0x43   : > { %623 = vmatpush1.bf16.msra.mxu0 %v622_v13  ;;  %271 = vperm.xlu0 %686, %v261_v17   ;;  %p724_p12 = pnand %p723_p6, %p1039_p11  ;;  %s726_s17 = sshll.u32 %s797_s4, 4  ;;  %s727_s17 = int_to_ptr.vmem [resolvable:$false] %s726_s17 }
  0x44   : > { %602 = vmatprep.subr.msk.mxu0 %vm297_vm0, %v259_v16  ;;  %281 = vperm.xlu1 %687, %v263_v18   ;;  %s728_s19 = scalar_lea.vmem %s727_s17, 64  ;;  %p729_p4 = scmp.lt.s32.totalorder %s985_s7, %s727_s17 }
  0x45   : > { %p725_p13 = pneg %p724_p12  ;;  %p730_p10 = scmp.lt.s32.totalorder %s728_s19, %s722_s14 }
  0x47   : > { %603 = vmatpush1.msk.msra.mxu0 %vm297_vm0, %v258_v19  ;;  %p731_p1 = por %p730_p10, %p729_p4 }
  0x48   : > { %604 = vmatmul.mubr.msk.f32.vlgmr.msra.gmra.mrb[0].mxu0 %vm284_vm1, %v246_v20 }
  0x49   : > { %374 = vmatprep.mubr.f32.mxu0 %v794_v0  ;;  %p732_p3 = pnand %p731_p1, %p725_p13 }
  0x4c   : > { %605 = vmatmul.mubr.msk.f32.gmra.mrb[2].mxu0 %vm284_vm1, %v247_v21 }
  0x4d   : > { %380 = vmatprep.mubr.f32.mxu0 %v794_v0 }
  0x50   : > { %606 = vmatmul.mubr.msk.f32.gmra.mrb[4].mxu0 %vm284_vm1, %v248_v22 }
  0x51   : > { %386 = vmatprep.mubr.f32.mxu0 %v794_v0  ;;  %v796_v0 = vmov 1966171168  }
  0x52   : > { %v491_v1 = vunpack.c.l.s4 %v796_v0 }
  0x54   : > { %607 = vmatmul.mubr.msk.f32.gmra.mrb[6].mxu0 %vm284_vm1, %v249_v23  ;;  %v492_v4 = vunpack.c.0.s8 %v491_v1 }
  0x56   : > { %v495_v11 = vsub.s32 %v492_v4, %v494_v5 }
  0xbe   : > { %v267_v24 = vpop.permute.xlu0 %266 }
  0xbf   : > { %v277_v33 = vpop.permute.xlu1 %276 }
  0xc2   : > { %v272_v27 = vpop.permute.xlu0 %271 }
  0xc3   : > { %v282_v44 = vpop.permute.xlu1 %281 }
 0x11b   : > { %v370_v25 = vpop.f32.mrb[0].mxu0 }
 0x11c   : > { %v372_v26 = vpop.f32.mrb[1].mxu0  ;;  %v371_v28 = vadd.f32 %v370_v25, %v267_v24 }
 0x11d   : > { %v373_v29 = vadd.f32 %v372_v26, %v267_v24 }
 0x11e   : > { %v393_v35 = vmax.f32 %v371_v28, 0.0 }
 0x11f   : > { %v376_v30 = vpop.f32.mrb[2].mxu0  ;;  %v394_v37 = vmax.f32 %v373_v29, 0.0 }
 0x120   : > { %v377_v31 = vadd.f32 %v376_v30, %v272_v27  ;;  %v378_v32 = vpop.f32.mrb[3].mxu0 }
 0x121   : > { %v379_v34 = vadd.f32 %v378_v32, %v272_v27 }
 0x122   : > { %v395_v36 = vmax.f32 %v377_v31, 0.0 }
 0x123   : > { %v396_v38 = vmax.f32 %v379_v34, 0.0  ;;  %v382_v39 = vpop.f32.mrb[4].mxu0 }
 0x124   : > { %v384_v40 = vpop.f32.mrb[5].mxu0  ;;  %v626_v41 = vpack.c.bf16 %v395_v36, %v393_v35  ;;  %v383_v43 = vadd.f32 %v382_v39, %v277_v33 }
 0x125   : > { %v624_v42 = vpack.c.bf16 %v396_v38, %v394_v37  ;;  %v385_v45 = vadd.f32 %v384_v40, %v277_v33 }
 0x126   : > { %v397_v50 = vmax.f32 %v383_v43, 0.0 }
 0x127   : > { %v388_v46 = vpop.f32.mrb[6].mxu0  ;;  %625 = vmatprep.subr.bf16.mxu1 %v624_v42  ;;  %v398_v52 = vmax.f32 %v385_v45, 0.0 }
 0x128   : > { %v389_v47 = vadd.f32 %v388_v46, %v282_v44  ;;  %v390_v48 = vpop.f32.mrb[7].mxu0  ;;  %627 = vmatpush1.bf16.msra.mxu1 %v626_v41 }
 0x129   : > { %v391_v49 = vadd.f32 %v390_v48, %v282_v44 }
 0x12a   : > { %v399_v51 = vmax.f32 %v389_v47, 0.0 }
 0x12b   : > { %v400_v53 = vmax.f32 %v391_v49, 0.0 }
 0x12c   : > { %v630_v54 = vpack.c.bf16 %v399_v51, %v397_v50 }
 0x12d   : > { %v628_v55 = vpack.c.bf16 %v400_v53, %v398_v52 }
 0x12f   : > { %629 = vmatprep.subr.bf16.mxu1 %v628_v55 }
 0x130   : > { %631 = vmatpush1.bf16.msra.mxu1 %v630_v54 }
 0x133   : > { %608 = vmatmul.mubr.msk.f32.vlgmr.msra.gmra.mrb[0].mxu1 %vm404_vm2, %v401_v56 }
 0x206   : > { %v474_v58 = vpop.f32.mrb[0].mxu1 }
 0x207   : > { %v475_v59 = vadd.f32 %v474_v58, %v403_v57  ;;  %v476_v60 = vpop.f32.mrb[1].mxu1 }
 0x208   : > { %v477_v61 = vadd.f32 %v476_v60, %v403_v57 }
 0x209   : > { %v479_v62 = vmul.f32 0.5, %v475_v59 }
 0x20a   : > { %v480_v63 = vmul.f32 0.5, %v477_v61 }
 0x20b   : > { %688 = vtanh.f32 %v479_v62 }
 0x20c   : > { %690 = vtanh.f32 %v480_v63 }
 0x215   : > { %v689_v3 = vpop.eup %688 }
 0x216   : > { %v691_v6 = vpop.eup %690  ;;  %v483_v7 = vadd.f32 1.0, %v689_v3 }
 0x217   : > { %v484_v8 = vadd.f32 1.0, %v691_v6 }
 0x218   : > { %v485_v9 = vmul.f32 0.5, %v483_v7 }
 0x219   : > { %v486_v10 = vmul.f32 0.5, %v484_v8 }
 0x21b   : > { %v489_v12 = vcombine.low %v485_v9, %v486_v10 }
 0x21d   : > { %v496_v13 = vrot.slane %v489_v12, %v495_v11 }
 0x21f   : > { %v503_v14 = vrot.slane %v496_v13, %v495_v11 }
 0x221   : > { %509 = vst.msk [vmem:[%s243_s27] sm:$0x3] %vm507_vm3, %v503_v14 }
 0x222   : > { %735 = shalt.err (!%p732_p3)
}
 0x223   : > { %s736_s18 = scalar_lea.hbm %s983_s10, 32  ;;  %s740_s29 = scalar_lea.hbm %s1032_s5, 64 }
 0x224   : > { %p737_p5 = scmp.ne.s32.totalorder %s983_s10, %s736_s18  ;;  %p741_p9 = scmp.lt.u32.totalorder %s983_s10, %s1032_s5 }
 0x225   : > { %p742_p0 = scmp.lt.u32.totalorder %s740_s29, %s736_s18  ;;  %p744_p6 = scmp.lt.u32.totalorder %s736_s18, %s983_s10 }
 0x226   : > { %p738_p7 = pnand %p737_p5, %p1039_p11 }
 0x227   : > { %p743_p2 = por %p742_p0, %p741_p9 }
 0x228   : > { %p739_p8 = pneg %p738_p7 }
 0x229   : > { %p745_p12 = por %p744_p6, %p743_p2 }
 0x22b   : > { %p746_p13 = pnand %p745_p12, %p739_p8 }
 0x22d   : > { %749 = shalt.err (!%p746_p13)
}
 0x22e   : > { %636 = dma.vmem_to_hbm [thread:$0]  (%p1039_p11), %s985_s7, 32, %s983_s10, %s511_s11  }
 0x22f PF: > { %s537_s15 = sand.u32 1, %s776_s20   ;;  %p1040_p4 = scmp.ne.s32.totalorder %s1036_s6, 0 }
 0x230   : > { %p1041_p10 = scmp.ge.s32.totalorder %s788_s23, 2  ;;  %s538_s16 = scalar_lea.sflag [#allocation5], %s537_s15 }
 0x232   : > { %p643_p1 = pnand %p1041_p10, %p1040_p4 }
 0x234   : > { %771 = dma.done.wait (!%p643_p1), %s538_s16, 32  }
 0x235   : > { %773 = vsyncadd (!%p643_p1), %s538_s16, 4294967264  ;;  %p19_p3 = scmp.ge.s32.totalorder %s856_s25, 4   ;;  %s1042_s20 = smov %s780_s21 }
 0x236   : > { %s1043_s21 = smov %s784_s22  ;;  %s1044_s22 = smov %s868_s28 }
 0x237   : > { %s1045_s23 = smov %s856_s25  ;;  %21 = sbr.rel (!%p19_p3) target bundleno = 7 (0x7), region = 85 }
 0x23e   :  { %543 = vsyncpa [#allocation4], 1 }
 0x23f   :  { %545 = vsyncpa [#allocation4 + $0x1], 1 }
 0x240   :  { %546 = vsyncpa [#allocation5], 1 }
 0x241   :  { %548 = vsyncpa [#allocation5 + $0x1], 1 }

</bundles_post_ra>
